<compile_context>
chip_gen: v5e
topology: v5e:2x2
jax: 0.10.0
libtpu: 0.0.40
codegen_flags: <defaults>
</compile_context>

<pallas_src>
import functools
import math

import jax
import jax.numpy as jnp
from jax.experimental import pallas as pl
from jax.experimental.pallas import tpu as pltpu


def _layer_norm(h, gamma, beta, eps=1e-5):
    # h: (T, D) f32, gamma/beta: (1, D) f32
    mu = jnp.mean(h, axis=-1, keepdims=True)
    var = jnp.mean((h - mu) ** 2, axis=-1, keepdims=True)
    return (h - mu) * jax.lax.rsqrt(var + eps) * gamma + beta


# --------------------------------------------------------------------------- #
# Phase 1: LN1 + fused QKV projection, written out head-major (B, H, S, d_k). #
# --------------------------------------------------------------------------- #
def _qkv_proj_kernel(x_ref, ln1_g_ref, ln1_b_ref, wq_ref, wkv_ref,
                     q_ref, k_ref, v_ref, *, n_heads, d_k, d_model):
    h = _layer_norm(x_ref[...], ln1_g_ref[...], ln1_b_ref[...])          # (tp, D) f32
    hb = h.astype(jnp.bfloat16)
    qf = jnp.dot(hb, wq_ref[...], preferred_element_type=jnp.float32)    # (tp, D)
    kvf = jnp.dot(hb, wkv_ref[...], preferred_element_type=jnp.float32)  # (tp, 2D)
    # Head-major scatter: runs once per token (NOT in the attention inner loop), so
    # the d_k-wide slices / masked stores here are negligible.
    for hh in range(n_heads):
        lo = hh * d_k
        q_ref[hh] = qf[:, lo:lo + d_k].astype(jnp.bfloat16)
        k_ref[hh] = kvf[:, lo:lo + d_k].astype(jnp.bfloat16)
        v_ref[hh] = kvf[:, d_model + lo:d_model + lo + d_k].astype(jnp.bfloat16)


# --------------------------------------------------------------------------- #
# Phase 2: flash attention (online softmax over kv tiles, batched over heads) #
# fused with output projection, residuals, LN2 and the GELU MLP at finalize.  #
# --------------------------------------------------------------------------- #
def _attn_mlp_kernel(x_ref, q_ref, k_ref, v_ref,
                     wo_ref, ln2_g_ref, ln2_b_ref, w1_ref, b1_ref, w2_ref, b2_ref,
                     o_ref, m_scr, l_scr, acc_scr, *, tk, kv_resident):
    ki = pl.program_id(2)
    nk = pl.num_programs(2)

    @pl.when(ki == 0)
    def _init():
        m_scr[...] = jnp.full(m_scr.shape, -jnp.inf, dtype=m_scr.dtype)
        l_scr[...] = jnp.zeros(l_scr.shape, dtype=l_scr.dtype)
        acc_scr[...] = jnp.zeros(acc_scr.shape, dtype=acc_scr.dtype)

    q = q_ref[...]                                              # (H, tq, d_k) bf16
    if kv_resident:
        # Full-sequence K/V resident per batch; take this step's kv tile (sublane slice).
        start = pl.multiple_of(ki * tk, tk)
        k_t = k_ref[:, pl.ds(start, tk), :]                     # (H, tk, d_k) bf16
        v_t = v_ref[:, pl.ds(start, tk), :]
    else:
        k_t = k_ref[...]
        v_t = v_ref[...]

    # scores for all heads in one batched MXU call (scale already folded into wq)
    s = jnp.einsum('hqd,hkd->hqk', q, k_t,
                   preferred_element_type=jnp.float32)          # (H, tq, tk) f32

    m_prev = m_scr[...]                                         # (H, tq, 1)
    m_new = jnp.maximum(m_prev, jnp.max(s, axis=-1, keepdims=True))
    alpha = jnp.exp(m_prev - m_new)
    p = jnp.exp(s - m_new)
    l_scr[...] = alpha * l_scr[...] + jnp.sum(p, axis=-1, keepdims=True)
    acc_scr[...] = alpha * acc_scr[...] + jnp.einsum(
        'hqk,hkd->hqd', p.astype(jnp.bfloat16), v_t,
        preferred_element_type=jnp.float32)                     # (H, tq, d_k)
    m_scr[...] = m_new

    @pl.when(ki == nk - 1)
    def _finalize():
        inv_l = pl.reciprocal(l_scr[...], approx=True)          # EUP slot, (H, tq, 1)
        norm = (acc_scr[...] * inv_l).astype(jnp.bfloat16)      # (H, tq, d_k)
        # Output projection: head-batched matmul against wo (H, d_k, D), then a cheap
        # VPU sum over the leading head dim == concat(heads) @ W_O.
        attn = jnp.einsum('hqd,hdn->hqn', norm, wo_ref[...],
                          preferred_element_type=jnp.float32)   # (H, tq, D) f32
        attn = jnp.sum(attn, axis=0)                            # (tq, D) f32

        x1 = x_ref[...] + attn                                  # residual 1

        h2 = _layer_norm(x1, ln2_g_ref[...], ln2_b_ref[...])
        z = jnp.dot(h2.astype(jnp.bfloat16), w1_ref[...],
                    preferred_element_type=jnp.float32) + b1_ref[...]
        # exact GELU (torch.nn.GELU default): 0.5*z*(1+erf(z/sqrt(2)))
        z = 0.5 * z * (1.0 + jax.lax.erf(z * (1.0 / math.sqrt(2.0))))
        z = jnp.dot(z.astype(jnp.bfloat16), w2_ref[...],
                    preferred_element_type=jnp.float32) + b2_ref[...]

        o_ref[...] = (x1 + z).astype(o_ref.dtype)               # residual 2


def _vmem_capacity_bytes():
    try:
        return int(pltpu.get_tpu_info().vmem_capacity_bytes)
    except Exception:
        return 128 * 1024 * 1024


def transformer_layer(x, params, n_heads, *, tq=None, tk=None):
    B, S, D = x.shape
    assert D % n_heads == 0
    d_k = D // n_heads
    (ln1_g, ln1_b, wq, wk, wv, wo, ln2_g, ln2_b, w1, b1, w2, b2) = params

    # ---- hardware-aware limits / tile defaults -------------------------------------
    vmem_cap = _vmem_capacity_bytes()
    vmem_limit = int(min((vmem_cap * 3) // 4, 100 * 1024 * 1024))   # ~48 MiB v7x, ~96 MiB v6e
    default_tile = 512 if vmem_cap >= 128 * 1024 * 1024 else 256    # v5e callers may pass 256
    if tq is None:
        tq = min(S, default_tile)
    if tk is None:
        tk = min(S, default_tile)
    assert S % tq == 0 and S % tk == 0

    # Full-sequence K/V residency per batch if it comfortably fits in VMEM
    # (K + V, bf16, x2 pipeline buffers, kept to <= 1/4 of the VMEM budget).
    kv_resident = (8 * S * D) <= (vmem_limit // 4)

    # ---- trace-time weight fusion / scaling / bf16 cast (outside the kernels) -------
    inv_sqrt_dk = 1.0 / math.sqrt(d_k)
    # (H, D, d_k) -> (D, H*d_k), head-major along lanes (matches reference concat order).
    wq_f = (jnp.transpose(wq, (1, 0, 2)).reshape(D, D) * inv_sqrt_dk).astype(jnp.bfloat16)
    wk_f = jnp.transpose(wk, (1, 0, 2)).reshape(D, D)
    wv_f = jnp.transpose(wv, (1, 0, 2)).reshape(D, D)
    wkv_f = jnp.concatenate([wk_f, wv_f], axis=1).astype(jnp.bfloat16)   # (D, 2D)
    wo_r = wo.reshape(n_heads, d_k, D).astype(jnp.bfloat16)              # (H, d_k, D)
    w1_b = w1.astype(jnp.bfloat16)
    w2_b = w2.astype(jnp.bfloat16)

    cp2 = pltpu.CompilerParams(
        dimension_semantics=("parallel", "parallel"),
        vmem_limit_bytes=vmem_limit)
    cp3 = pltpu.CompilerParams(
        dimension_semantics=("parallel", "parallel", "arbitrary"),
        vmem_limit_bytes=vmem_limit)

    # Grid-invariant blocks: single-buffered (no wasted double-buffer VMEM).
    def _inv2(a):
        zeros = (0,) * a.ndim
        return pl.BlockSpec(a.shape, lambda b, si: zeros,
                            pipeline_mode=pl.Buffered(1))

    def _inv3(a):
        zeros = (0,) * a.ndim
        return pl.BlockSpec(a.shape, lambda b, qi, ki: zeros,
                            pipeline_mode=pl.Buffered(1))

    # ---- Phase 1: LN1 + fused QKV projection -> head-major (B, H, S, d_k) bf16 ------
    qkv_out_spec = pl.BlockSpec((None, n_heads, tq, d_k), lambda b, si: (b, 0, si, 0))
    q_hm, k_hm, v_hm = pl.pallas_call(
        functools.partial(_qkv_proj_kernel, n_heads=n_heads, d_k=d_k, d_model=D),
        out_shape=tuple(jax.ShapeDtypeStruct((B, n_heads, S, d_k), jnp.bfloat16)
                        for _ in range(3)),
        grid=(B, S // tq),
        in_specs=[
            pl.BlockSpec((None, tq, D), lambda b, si: (b, si, 0)),
            _inv2(ln1_g), _inv2(ln1_b), _inv2(wq_f), _inv2(wkv_f),
        ],
        out_specs=(qkv_out_spec, qkv_out_spec, qkv_out_spec),
        compiler_params=cp2,
    )(x, ln1_g, ln1_b, wq_f, wkv_f)

    # ---- Phase 2: flash attention + output proj + residual + LN2 + MLP + residual ---
    if kv_resident:
        kv_spec = pl.BlockSpec((None, n_heads, S, d_k), lambda b, qi, ki: (b, 0, 0, 0))
    else:
        kv_spec = pl.BlockSpec((None, n_heads, tk, d_k), lambda b, qi, ki: (b, 0, ki, 0))

    out = pl.pallas_call(
        functools.partial(_attn_mlp_kernel, tk=tk, kv_resident=kv_resident),
        out_shape=jax.ShapeDtypeStruct((B, S, D), jnp.float32),
        grid=(B, S // tq, S // tk),
        in_specs=[
            pl.BlockSpec((None, tq, D), lambda b, qi, ki: (b, qi, 0)),            # x (residual)
            pl.BlockSpec((None, n_heads, tq, d_k), lambda b, qi, ki: (b, 0, qi, 0)),  # Q
            kv_spec,                                                              # K
            kv_spec,                                                              # V
            _inv3(wo_r), _inv3(ln2_g), _inv3(ln2_b),
            _inv3(w1_b), _inv3(b1), _inv3(w2_b), _inv3(b2),
        ],
        out_specs=pl.BlockSpec((None, tq, D), lambda b, qi, ki: (b, qi, 0)),
        scratch_shapes=[
            pltpu.VMEM((n_heads, tq, 1), jnp.float32),     # m: running max (minor: 1-lane)
            pltpu.VMEM((n_heads, tq, 1), jnp.float32),     # l: running sum
            pltpu.VMEM((n_heads, tq, d_k), jnp.float32),   # acc: running numerator
        ],
        compiler_params=cp3,
    )(x, q_hm, k_hm, v_hm, wo_r, ln2_g, ln2_b, w1_b, b1, w2_b, b2)
    return out


def make_params(key, dim, n_heads):
    d_k = dim // n_heads
    scale = dim ** (-0.5)
    ks = jax.random.split(key, 8)
    # LayerNorm params: PyTorch default init (ones / zeros).
    ln1_g = jnp.ones((1, dim), jnp.float32)
    ln1_b = jnp.zeros((1, dim), jnp.float32)
    ln2_g = jnp.ones((1, dim), jnp.float32)
    ln2_b = jnp.zeros((1, dim), jnp.float32)
    # MHSA params: scale * randn, stacked over heads (PyTorch-module layout).
    wq = scale * jax.random.normal(ks[0], (n_heads, dim, d_k), jnp.float32)
    wk = scale * jax.random.normal(ks[1], (n_heads, dim, d_k), jnp.float32)
    wv = scale * jax.random.normal(ks[2], (n_heads, dim, d_k), jnp.float32)
    wo = scale * jax.random.normal(ks[3], (n_heads * d_k, dim), jnp.float32)
    # MLP Linear params, stored as (in, out) so kernel does x @ W + b.
    lim = 1.0 / math.sqrt(dim)
    w1 = jax.random.uniform(ks[4], (dim, dim), jnp.float32, -lim, lim)
    b1 = jax.random.uniform(ks[5], (1, dim), jnp.float32, -lim, lim)
    w2 = jax.random.uniform(ks[6], (dim, dim), jnp.float32, -lim, lim)
    b2 = jax.random.uniform(ks[7], (1, dim), jnp.float32, -lim, lim)
    return (ln1_g, ln1_b, wq, wk, wv, wo, ln2_g, ln2_b, w1, b1, w2, b2)


def transformer_layer_ref(x, params, n_heads):
    """Pure-JAX f32 reference mirroring the PyTorch forward."""
    (ln1_g, ln1_b, wq, wk, wv, wo, ln2_g, ln2_b, w1, b1, w2, b2) = params
    D = x.shape[-1]
    d_k = D // n_heads

    def ln(h, g, b):
        mu = jnp.mean(h, axis=-1, keepdims=True)
        var = jnp.mean((h - mu) ** 2, axis=-1, keepdims=True)
        return (h - mu) / jnp.sqrt(var + 1e-5) * g + b

    h = ln(x, ln1_g, ln1_b)
    heads = []
    for i in range(n_heads):
        q = h @ wq[i]; k = h @ wk[i]; v = h @ wv[i]
        s = jnp.einsum("bqd,bkd->bqk", q, k) / math.sqrt(d_k)
        p = jax.nn.softmax(s, axis=-1)
        heads.append(p @ v)
    attn = jnp.concatenate(heads, axis=-1) @ wo
    x1 = x + attn
    h2 = ln(x1, ln2_g, ln2_b)
    z = h2 @ w1 + b1
    z = 0.5 * z * (1.0 + jax.lax.erf(z / math.sqrt(2.0)))
    z = z @ w2 + b2
    return x1 + z


if __name__ == "__main__":
    B, S, D, H = 2, 8, 32, 4
    key = jax.random.PRNGKey(0)
    kx, kp = jax.random.split(key)
    x = jax.random.normal(kx, (B, S, D), jnp.float32)
    params = make_params(kp, D, H)

    out = transformer_layer(x, params, H)
    out = jax.block_until_ready(out)

    ref = transformer_layer_ref(x, params, H)
    assert out.shape == (B, S, D)
    # bf16 MXU matmuls + approx reciprocal -> relaxed tolerance vs f32 reference.
    assert jnp.allclose(out, ref, atol=5e-2, rtol=5e-2), "mismatch vs JAX reference"

    print("KERNEL_OK")
</pallas_src>

<mosaic_0001>
module attributes {stable_mosaic.version = 11 : i64} {
  func.func @_qkv_proj_kernel(%arg0: i32, %arg1: i32, %arg2: memref<1x8x32xf32, #tpu.memory_space<vmem>>, %arg3: memref<1x32xf32, #tpu.memory_space<vmem>>, %arg4: memref<1x32xf32, #tpu.memory_space<vmem>>, %arg5: memref<32x32xbf16, #tpu.memory_space<vmem>>, %arg6: memref<32x64xbf16, #tpu.memory_space<vmem>>, %arg7: memref<1x4x8x8xbf16, #tpu.memory_space<vmem>>, %arg8: memref<1x4x8x8xbf16, #tpu.memory_space<vmem>>, %arg9: memref<1x4x8x8xbf16, #tpu.memory_space<vmem>>) attributes {dimension_semantics = [#tpu.dimension_semantics<parallel>, #tpu.dimension_semantics<parallel>], iteration_bounds = array<i64: 2, 1>, scalar_prefetch = 0 : i64, scratch_operands = 0 : i64, tpu.core_type = #tpu.core_type<tc>, window_params = [{transform_indices = @transform_0, window_bounds = array<i64: 1, 8, 32>}, {pipeline_mode = #tpu.pipeline_mode<synchronous>, transform_indices = @transform_1, window_bounds = array<i64: 1, 32>}, {pipeline_mode = #tpu.pipeline_mode<synchronous>, transform_indices = @transform_2, window_bounds = array<i64: 1, 32>}, {pipeline_mode = #tpu.pipeline_mode<synchronous>, transform_indices = @transform_3, window_bounds = array<i64: 32, 32>}, {pipeline_mode = #tpu.pipeline_mode<synchronous>, transform_indices = @transform_4, window_bounds = array<i64: 32, 64>}, {transform_indices = @transform_5, window_bounds = array<i64: 1, 4, 8, 8>}, {transform_indices = @transform_6, window_bounds = array<i64: 1, 4, 8, 8>}, {transform_indices = @transform_7, window_bounds = array<i64: 1, 4, 8, 8>}]} {
    %c0 = arith.constant 0 : index
    %c0_0 = arith.constant 0 : index
    %c0_1 = arith.constant 0 : index
    %0 = vector.load %arg2[%c0, %c0_0, %c0_1] : memref<1x8x32xf32, #tpu.memory_space<vmem>>, vector<1x8x32xf32>
    %1 = vector.shape_cast %0 : vector<1x8x32xf32> to vector<8x32xf32>
    %c0_2 = arith.constant 0 : index
    %c0_3 = arith.constant 0 : index
    %2 = vector.load %arg3[%c0_2, %c0_3] : memref<1x32xf32, #tpu.memory_space<vmem>>, vector<1x32xf32>
    %c0_4 = arith.constant 0 : index
    %c0_5 = arith.constant 0 : index
    %3 = vector.load %arg4[%c0_4, %c0_5] : memref<1x32xf32, #tpu.memory_space<vmem>>, vector<1x32xf32>
    %cst = arith.constant dense<0.000000e+00> : vector<8xf32>
    %4 = vector.multi_reduction <add>, %1, %cst [1] : vector<8x32xf32> to vector<8xf32>
    %5 = vector.shape_cast %4 : vector<8xf32> to vector<8x1xf32>
    %cst_6 = arith.constant 3.200000e+01 : f32
    %6 = vector.broadcast %cst_6 : f32 to vector<8x1xf32>
    %7 = arith.divf %5, %6 : vector<8x1xf32>
    %8 = vector.broadcast %7 : vector<8x1xf32> to vector<8x32xf32>
    %9 = arith.subf %1, %8 : vector<8x32xf32>
    %10 = arith.mulf %9, %9 : vector<8x32xf32>
    %cst_7 = arith.constant dense<0.000000e+00> : vector<8xf32>
    %11 = vector.multi_reduction <add>, %10, %cst_7 [1] : vector<8x32xf32> to vector<8xf32>
    %12 = vector.shape_cast %11 : vector<8xf32> to vector<8x1xf32>
    %cst_8 = arith.constant 3.200000e+01 : f32
    %13 = vector.broadcast %cst_8 : f32 to vector<8x1xf32>
    %14 = arith.divf %12, %13 : vector<8x1xf32>
    %15 = vector.broadcast %7 : vector<8x1xf32> to vector<8x32xf32>
    %16 = arith.subf %1, %15 : vector<8x32xf32>
    %cst_9 = arith.constant 9.99999974E-6 : f32
    %17 = vector.broadcast %cst_9 : f32 to vector<8x1xf32>
    %18 = arith.addf %14, %17 : vector<8x1xf32>
    %19 = math.rsqrt %18 : vector<8x1xf32>
    %20 = vector.broadcast %19 : vector<8x1xf32> to vector<8x32xf32>
    %21 = arith.mulf %16, %20 : vector<8x32xf32>
    %22 = vector.broadcast %2 : vector<1x32xf32> to vector<8x32xf32>
    %23 = arith.mulf %21, %22 : vector<8x32xf32>
    %24 = vector.broadcast %3 : vector<1x32xf32> to vector<8x32xf32>
    %25 = arith.addf %23, %24 : vector<8x32xf32>
    %26 = arith.truncf %25 : vector<8x32xf32> to vector<8x32xbf16>
    %c0_10 = arith.constant 0 : index
    %c0_11 = arith.constant 0 : index
    %27 = vector.load %arg5[%c0_10, %c0_11] : memref<32x32xbf16, #tpu.memory_space<vmem>>, vector<32x32xbf16>
    %cst_12 = arith.constant dense<0.000000e+00> : vector<8x32xf32>
    %28 = tpu.matmul %26, %27, %cst_12 {dimension_numbers = #tpu.dot_dimension_numbers<[1], [0], [0], [1], [0, 0, 1, 1], [], []>} : vector<8x32xbf16>, vector<32x32xbf16>, vector<8x32xf32> -> vector<8x32xf32>
    %c0_13 = arith.constant 0 : index
    %c0_14 = arith.constant 0 : index
    %29 = vector.load %arg6[%c0_13, %c0_14] : memref<32x64xbf16, #tpu.memory_space<vmem>>, vector<32x64xbf16>
    %cst_15 = arith.constant dense<0.000000e+00> : vector<8x64xf32>
    %30 = tpu.matmul %26, %29, %cst_15 {dimension_numbers = #tpu.dot_dimension_numbers<[1], [0], [0], [1], [0, 0, 1, 1], [], []>} : vector<8x32xbf16>, vector<32x64xbf16>, vector<8x64xf32> -> vector<8x64xf32>
    %31 = vector.extract_strided_slice %28 {offsets = [0, 0], sizes = [8, 8], strides = [1, 1]} : vector<8x32xf32> to vector<8x8xf32>
    %32 = arith.truncf %31 : vector<8x8xf32> to vector<8x8xbf16>
    %c0_16 = arith.constant 0 : index
    %c0_17 = arith.constant 0 : index
    %c0_18 = arith.constant 0 : index
    %c0_19 = arith.constant 0 : index
    %33 = vector.load %arg7[%c0_16, %c0_17, %c0_18, %c0_19] : memref<1x4x8x8xbf16, #tpu.memory_space<vmem>>, vector<1x1x8x8xbf16>
    %34 = vector.shape_cast %33 : vector<1x1x8x8xbf16> to vector<8x8xbf16>
    %35 = vector.shape_cast %32 : vector<8x8xbf16> to vector<1x1x8x8xbf16>
    tpu.vector_store %arg7[%c0_16, %c0_17, %c0_18, %c0_19], %35 {strides = array<i32>} : memref<1x4x8x8xbf16, #tpu.memory_space<vmem>>, vector<1x1x8x8xbf16>,
    %36 = vector.extract_strided_slice %30 {offsets = [0, 0], sizes = [8, 8], strides = [1, 1]} : vector<8x64xf32> to vector<8x8xf32>
    %37 = arith.truncf %36 : vector<8x8xf32> to vector<8x8xbf16>
    %c0_20 = arith.constant 0 : index
    %c0_21 = arith.constant 0 : index
    %c0_22 = arith.constant 0 : index
    %c0_23 = arith.constant 0 : index
    %38 = vector.load %arg8[%c0_20, %c0_21, %c0_22, %c0_23] : memref<1x4x8x8xbf16, #tpu.memory_space<vmem>>, vector<1x1x8x8xbf16>
    %39 = vector.shape_cast %38 : vector<1x1x8x8xbf16> to vector<8x8xbf16>
    %40 = vector.shape_cast %37 : vector<8x8xbf16> to vector<1x1x8x8xbf16>
    tpu.vector_store %arg8[%c0_20, %c0_21, %c0_22, %c0_23], %40 {strides = array<i32>} : memref<1x4x8x8xbf16, #tpu.memory_space<vmem>>, vector<1x1x8x8xbf16>,
    %41 = vector.extract_strided_slice %30 {offsets = [0, 32], sizes = [8, 8], strides = [1, 1]} : vector<8x64xf32> to vector<8x8xf32>
    %42 = arith.truncf %41 : vector<8x8xf32> to vector<8x8xbf16>
    %c0_24 = arith.constant 0 : index
    %c0_25 = arith.constant 0 : index
    %c0_26 = arith.constant 0 : index
    %c0_27 = arith.constant 0 : index
    %43 = vector.load %arg9[%c0_24, %c0_25, %c0_26, %c0_27] : memref<1x4x8x8xbf16, #tpu.memory_space<vmem>>, vector<1x1x8x8xbf16>
    %44 = vector.shape_cast %43 : vector<1x1x8x8xbf16> to vector<8x8xbf16>
    %45 = vector.shape_cast %42 : vector<8x8xbf16> to vector<1x1x8x8xbf16>
    tpu.vector_store %arg9[%c0_24, %c0_25, %c0_26, %c0_27], %45 {strides = array<i32>} : memref<1x4x8x8xbf16, #tpu.memory_space<vmem>>, vector<1x1x8x8xbf16>,
    %46 = vector.extract_strided_slice %28 {offsets = [0, 8], sizes = [8, 8], strides = [1, 1]} : vector<8x32xf32> to vector<8x8xf32>
    %47 = arith.truncf %46 : vector<8x8xf32> to vector<8x8xbf16>
    %c0_28 = arith.constant 0 : index
    %c1 = arith.constant 1 : index
    %c0_29 = arith.constant 0 : index
    %c0_30 = arith.constant 0 : index
    %48 = vector.load %arg7[%c0_28, %c1, %c0_29, %c0_30] : memref<1x4x8x8xbf16, #tpu.memory_space<vmem>>, vector<1x1x8x8xbf16>
    %49 = vector.shape_cast %48 : vector<1x1x8x8xbf16> to vector<8x8xbf16>
    %50 = vector.shape_cast %47 : vector<8x8xbf16> to vector<1x1x8x8xbf16>
    tpu.vector_store %arg7[%c0_28, %c1, %c0_29, %c0_30], %50 {strides = array<i32>} : memref<1x4x8x8xbf16, #tpu.memory_space<vmem>>, vector<1x1x8x8xbf16>,
    %51 = vector.extract_strided_slice %30 {offsets = [0, 8], sizes = [8, 8], strides = [1, 1]} : vector<8x64xf32> to vector<8x8xf32>
    %52 = arith.truncf %51 : vector<8x8xf32> to vector<8x8xbf16>
    %c0_31 = arith.constant 0 : index
    %c1_32 = arith.constant 1 : index
    %c0_33 = arith.constant 0 : index
    %c0_34 = arith.constant 0 : index
    %53 = vector.load %arg8[%c0_31, %c1_32, %c0_33, %c0_34] : memref<1x4x8x8xbf16, #tpu.memory_space<vmem>>, vector<1x1x8x8xbf16>
    %54 = vector.shape_cast %53 : vector<1x1x8x8xbf16> to vector<8x8xbf16>
    %55 = vector.shape_cast %52 : vector<8x8xbf16> to vector<1x1x8x8xbf16>
    tpu.vector_store %arg8[%c0_31, %c1_32, %c0_33, %c0_34], %55 {strides = array<i32>} : memref<1x4x8x8xbf16, #tpu.memory_space<vmem>>, vector<1x1x8x8xbf16>,
    %56 = vector.extract_strided_slice %30 {offsets = [0, 40], sizes = [8, 8], strides = [1, 1]} : vector<8x64xf32> to vector<8x8xf32>
    %57 = arith.truncf %56 : vector<8x8xf32> to vector<8x8xbf16>
    %c0_35 = arith.constant 0 : index
    %c1_36 = arith.constant 1 : index
    %c0_37 = arith.constant 0 : index
    %c0_38 = arith.constant 0 : index
    %58 = vector.load %arg9[%c0_35, %c1_36, %c0_37, %c0_38] : memref<1x4x8x8xbf16, #tpu.memory_space<vmem>>, vector<1x1x8x8xbf16>
    %59 = vector.shape_cast %58 : vector<1x1x8x8xbf16> to vector<8x8xbf16>
    %60 = vector.shape_cast %57 : vector<8x8xbf16> to vector<1x1x8x8xbf16>
    tpu.vector_store %arg9[%c0_35, %c1_36, %c0_37, %c0_38], %60 {strides = array<i32>} : memref<1x4x8x8xbf16, #tpu.memory_space<vmem>>, vector<1x1x8x8xbf16>,
    %61 = vector.extract_strided_slice %28 {offsets = [0, 16], sizes = [8, 8], strides = [1, 1]} : vector<8x32xf32> to vector<8x8xf32>
    %62 = arith.truncf %61 : vector<8x8xf32> to vector<8x8xbf16>
    %c0_39 = arith.constant 0 : index
    %c2 = arith.constant 2 : index
    %c0_40 = arith.constant 0 : index
    %c0_41 = arith.constant 0 : index
    %63 = vector.load %arg7[%c0_39, %c2, %c0_40, %c0_41] : memref<1x4x8x8xbf16, #tpu.memory_space<vmem>>, vector<1x1x8x8xbf16>
    %64 = vector.shape_cast %63 : vector<1x1x8x8xbf16> to vector<8x8xbf16>
    %65 = vector.shape_cast %62 : vector<8x8xbf16> to vector<1x1x8x8xbf16>
    tpu.vector_store %arg7[%c0_39, %c2, %c0_40, %c0_41], %65 {strides = array<i32>} : memref<1x4x8x8xbf16, #tpu.memory_space<vmem>>, vector<1x1x8x8xbf16>,
    %66 = vector.extract_strided_slice %30 {offsets = [0, 16], sizes = [8, 8], strides = [1, 1]} : vector<8x64xf32> to vector<8x8xf32>
    %67 = arith.truncf %66 : vector<8x8xf32> to vector<8x8xbf16>
    %c0_42 = arith.constant 0 : index
    %c2_43 = arith.constant 2 : index
    %c0_44 = arith.constant 0 : index
    %c0_45 = arith.constant 0 : index
    %68 = vector.load %arg8[%c0_42, %c2_43, %c0_44, %c0_45] : memref<1x4x8x8xbf16, #tpu.memory_space<vmem>>, vector<1x1x8x8xbf16>
    %69 = vector.shape_cast %68 : vector<1x1x8x8xbf16> to vector<8x8xbf16>
    %70 = vector.shape_cast %67 : vector<8x8xbf16> to vector<1x1x8x8xbf16>
    tpu.vector_store %arg8[%c0_42, %c2_43, %c0_44, %c0_45], %70 {strides = array<i32>} : memref<1x4x8x8xbf16, #tpu.memory_space<vmem>>, vector<1x1x8x8xbf16>,
    %71 = vector.extract_strided_slice %30 {offsets = [0, 48], sizes = [8, 8], strides = [1, 1]} : vector<8x64xf32> to vector<8x8xf32>
    %72 = arith.truncf %71 : vector<8x8xf32> to vector<8x8xbf16>
    %c0_46 = arith.constant 0 : index
    %c2_47 = arith.constant 2 : index
    %c0_48 = arith.constant 0 : index
    %c0_49 = arith.constant 0 : index
    %73 = vector.load %arg9[%c0_46, %c2_47, %c0_48, %c0_49] : memref<1x4x8x8xbf16, #tpu.memory_space<vmem>>, vector<1x1x8x8xbf16>
    %74 = vector.shape_cast %73 : vector<1x1x8x8xbf16> to vector<8x8xbf16>
    %75 = vector.shape_cast %72 : vector<8x8xbf16> to vector<1x1x8x8xbf16>
    tpu.vector_store %arg9[%c0_46, %c2_47, %c0_48, %c0_49], %75 {strides = array<i32>} : memref<1x4x8x8xbf16, #tpu.memory_space<vmem>>, vector<1x1x8x8xbf16>,
    %76 = vector.extract_strided_slice %28 {offsets = [0, 24], sizes = [8, 8], strides = [1, 1]} : vector<8x32xf32> to vector<8x8xf32>
    %77 = arith.truncf %76 : vector<8x8xf32> to vector<8x8xbf16>
    %c0_50 = arith.constant 0 : index
    %c3 = arith.constant 3 : index
    %c0_51 = arith.constant 0 : index
    %c0_52 = arith.constant 0 : index
    %78 = vector.load %arg7[%c0_50, %c3, %c0_51, %c0_52] : memref<1x4x8x8xbf16, #tpu.memory_space<vmem>>, vector<1x1x8x8xbf16>
    %79 = vector.shape_cast %78 : vector<1x1x8x8xbf16> to vector<8x8xbf16>
    %80 = vector.shape_cast %77 : vector<8x8xbf16> to vector<1x1x8x8xbf16>
    tpu.vector_store %arg7[%c0_50, %c3, %c0_51, %c0_52], %80 {strides = array<i32>} : memref<1x4x8x8xbf16, #tpu.memory_space<vmem>>, vector<1x1x8x8xbf16>,
    %81 = vector.extract_strided_slice %30 {offsets = [0, 24], sizes = [8, 8], strides = [1, 1]} : vector<8x64xf32> to vector<8x8xf32>
    %82 = arith.truncf %81 : vector<8x8xf32> to vector<8x8xbf16>
    %c0_53 = arith.constant 0 : index
    %c3_54 = arith.constant 3 : index
    %c0_55 = arith.constant 0 : index
    %c0_56 = arith.constant 0 : index
    %83 = vector.load %arg8[%c0_53, %c3_54, %c0_55, %c0_56] : memref<1x4x8x8xbf16, #tpu.memory_space<vmem>>, vector<1x1x8x8xbf16>
    %84 = vector.shape_cast %83 : vector<1x1x8x8xbf16> to vector<8x8xbf16>
    %85 = vector.shape_cast %82 : vector<8x8xbf16> to vector<1x1x8x8xbf16>
    tpu.vector_store %arg8[%c0_53, %c3_54, %c0_55, %c0_56], %85 {strides = array<i32>} : memref<1x4x8x8xbf16, #tpu.memory_space<vmem>>, vector<1x1x8x8xbf16>,
    %86 = vector.extract_strided_slice %30 {offsets = [0, 56], sizes = [8, 8], strides = [1, 1]} : vector<8x64xf32> to vector<8x8xf32>
    %87 = arith.truncf %86 : vector<8x8xf32> to vector<8x8xbf16>
    %c0_57 = arith.constant 0 : index
    %c3_58 = arith.constant 3 : index
    %c0_59 = arith.constant 0 : index
    %c0_60 = arith.constant 0 : index
    %88 = vector.load %arg9[%c0_57, %c3_58, %c0_59, %c0_60] : memref<1x4x8x8xbf16, #tpu.memory_space<vmem>>, vector<1x1x8x8xbf16>
    %89 = vector.shape_cast %88 : vector<1x1x8x8xbf16> to vector<8x8xbf16>
    %90 = vector.shape_cast %87 : vector<8x8xbf16> to vector<1x1x8x8xbf16>
    tpu.vector_store %arg9[%c0_57, %c3_58, %c0_59, %c0_60], %90 {strides = array<i32>} : memref<1x4x8x8xbf16, #tpu.memory_space<vmem>>, vector<1x1x8x8xbf16>,
    return
  }
  func.func @transform_0(%arg0: i32, %arg1: i32) -> (i32, i32, i32) {
    %c0_i32 = arith.constant 0 : i32
    %c0_i32_0 = arith.constant 0 : i32
    return %arg0, %arg1, %c0_i32 : i32, i32, i32
  }
  func.func @transform_1(%arg0: i32, %arg1: i32) -> (i32, i32) {
    %c0_i32 = arith.constant 0 : i32
    %c0_i32_0 = arith.constant 0 : i32
    %c0_i32_1 = arith.constant 0 : i32
    return %c0_i32, %c0_i32_0 : i32, i32
  }
  func.func @transform_2(%arg0: i32, %arg1: i32) -> (i32, i32) {
    %c0_i32 = arith.constant 0 : i32
    %c0_i32_0 = arith.constant 0 : i32
    %c0_i32_1 = arith.constant 0 : i32
    return %c0_i32, %c0_i32_0 : i32, i32
  }
  func.func @transform_3(%arg0: i32, %arg1: i32) -> (i32, i32) {
    %c0_i32 = arith.constant 0 : i32
    %c0_i32_0 = arith.constant 0 : i32
    %c0_i32_1 = arith.constant 0 : i32
    return %c0_i32, %c0_i32_0 : i32, i32
  }
  func.func @transform_4(%arg0: i32, %arg1: i32) -> (i32, i32) {
    %c0_i32 = arith.constant 0 : i32
    %c0_i32_0 = arith.constant 0 : i32
    %c0_i32_1 = arith.constant 0 : i32
    return %c0_i32, %c0_i32_0 : i32, i32
  }
  func.func @transform_5(%arg0: i32, %arg1: i32) -> (i32, i32, i32, i32) {
    %c0_i32 = arith.constant 0 : i32
    %c0_i32_0 = arith.constant 0 : i32
    %c0_i32_1 = arith.constant 0 : i32
    return %arg0, %c0_i32, %arg1, %c0_i32_0 : i32, i32, i32, i32
  }
  func.func @transform_6(%arg0: i32, %arg1: i32) -> (i32, i32, i32, i32) {
    %c0_i32 = arith.constant 0 : i32
    %c0_i32_0 = arith.constant 0 : i32
    %c0_i32_1 = arith.constant 0 : i32
    return %arg0, %c0_i32, %arg1, %c0_i32_0 : i32, i32, i32, i32
  }
  func.func @transform_7(%arg0: i32, %arg1: i32) -> (i32, i32, i32, i32) {
    %c0_i32 = arith.constant 0 : i32
    %c0_i32_0 = arith.constant 0 : i32
    %c0_i32_1 = arith.constant 0 : i32
    return %arg0, %c0_i32, %arg1, %c0_i32_0 : i32, i32, i32, i32
  }
}

</mosaic_0001>

<bundles_post_ra>
// kernel: tpu_custom_call.1
= control target key start
LH: loop header
LB: loop body
LE: loop exit
PB: predicated region body
PF: predicated region fallthrough
CT: control target
= control target key end

     0   :  { %s1567_s0 = inlined_call_operand.hbm [shape: f32[2,8,32], index: 0, kind: input, shape index: {}]   ;;  %s1568_s1 = inlined_call_operand.hbm [shape: f32[1,32], index: 1, kind: input, shape index: {}]   ;;  %s1569_s2 = inlined_call_operand.vmem [shape: f32[1,32], index: 2, kind: input, shape index: {}]   ;;  %s1570_s3 = inlined_call_operand.hbm [shape: bf16[32,32], index: 3, kind: input, shape index: {}]   ;;  %s1571_s4 = inlined_call_operand.hbm [shape: bf16[32,64], index: 4, kind: input, shape index: {}]   ;;  %s1572_s5 = inlined_call_operand.hbm [shape: bf16[2,4,8,8], index: 5, kind: output, shape index: {0}]   ;;  %s1573_s6 = inlined_call_operand.hbm [shape: bf16[2,4,8,8], index: 6, kind: output, shape index: {1}]   ;;  %s1574_s7 = inlined_call_operand.hbm [shape: bf16[2,4,8,8], index: 7, kind: output, shape index: {2}]  }
   0x1   :  { %1577 = sst [smem:[#allocation20_spill]] %s1567_s0 }
   0x2   :  { %1578 = sst [smem:[#allocation21_spill]] %s1568_s1 }
   0x3   :  { %1579 = sst [smem:[#allocation22_spill]] %s1569_s2 }
   0x4   :  { %1580 = sst [smem:[#allocation23_spill]] %s1570_s3 }
   0x5   :  { %1581 = sst [smem:[#allocation24_spill]] %s1571_s4 }
   0x6   :  { %13 = vsyncpa [#allocation3], 0 }
   0x7   :  { %15 = vsyncpa [#allocation3 + $0x1], 0 }
   0x8   :  { %16 = vsyncpa [#allocation6], 0 }
   0x9   :  { %17 = vsyncpa [#allocation9], 0 }
   0xa   :  { %18 = vsyncpa [#allocation4], 0 }
   0xb   :  { %20 = vsyncpa [#allocation4 + $0x1], 0 }
   0xc   :  { %21 = vsyncpa [#allocation12], 0 }
   0xd   :  { %23 = vsyncpa [#allocation12 + $0x1], 0  ;;  %s1296_s24 = smov 0   ;;  %s1298_s25 = smov 0  }
   0xe   :  { %s1300_s26 = smov 0   ;;  %s1302_s27 = smov 0  }
   0xf   :  { %s1304_s28 = smov 0   ;;  %s1306_s29 = smov 0  }
  0x10 LB: > { %s1327_s30 = sadd.s32 4294967295, %s1239_s29   ;;  %s1575_s8 = sadd.s32 4294967294, %s1239_s29   ;;  %s1239_s29 = sphi %s1306_s29, %s29_s29   ;;  %s1235_s28 = sphi %s1304_s28, %s1600_s28   ;;  %s1231_s27 = sphi %s1302_s27, %s1599_s27   ;;  %s1227_s26 = sphi %s1300_s26, %s1598_s26   ;;  %s1223_s25 = sphi %s1298_s25, %s1597_s25   ;;  %s1219_s24 = sphi %s1296_s24, %s1596_s24  }
  0x11   : > { %p63_p0 = scmp.ne.s32.totalorder %s1223_s25, %s1219_s24  ;;  %p64_p1 = scmp.eq.s32.totalorder %s1327_s30, 0 }
  0x12   : > { %p173_p2 = scmp.eq.s32.totalorder %s1327_s30, 1  ;;  %p179_p3 = scmp.eq.s32.totalorder %s1575_s8, 1 }
  0x13   : > { %p1338_p4 = por %p64_p1, %p63_p0  ;;  %p788_p5 = scmp.ge.s32.totalorder %s1239_s29, 1 }
  0x14   : > { %p1343_p6 = por %p179_p3, %p63_p0  ;;  %p242_p7 = scmp.lt.s32.totalorder %s1239_s29, 3 }
  0x15   : > { %s1584_s1 = sld [smem:[#allocation21_spill]]  ;;  %p792_p9 = scmp.ge.s32.totalorder %s1239_s29, 2 }
  0x16   : > { %p1351_p8 = pnand %p788_p5, %p242_p7  ;;  %s1241_s15 = smov [#allocation5]  }
  0x17   : > { %s256_s16 = sshll.u32 %s1241_s15, 4  ;;  %s1586_s3 = sld [smem:[#allocation23_spill]]  ;;  %s257_s16 = int_to_ptr.vmem [resolvable:$true] %s256_s16 }
  0x18   : > { %p868_p10 = pneg %p1351_p8  ;;  %s1242_s21 = smov [#allocation7]  }
  0x19   : > { %s270_s22 = sshll.u32 %s1242_s21, 4  ;;  %s1243_s23 = smov 64   ;;  %s271_s22 = int_to_ptr.vmem [resolvable:$true] %s270_s22 }
  0x1a   : > { %p1363_p11 = pnand %p868_p10, %p64_p1  ;;  %s1244_s11 = smov 4  }
  0x1b   : > { %s254_s13 = sshll.u32 %s1584_s1, 4  ;;  %s1588_s4 = sld [smem:[#allocation24_spill]]  ;;  %s255_s13 = int_to_ptr.hbm [resolvable:$true] %s254_s13 }
  0x1c   : > { %871 = dma.hbm_to_vmem [thread:$0]  (!%p1363_p11), %s255_s13, 16, %s257_s16, [#allocation6]  }
  0x1d   : > { %s268_s19 = sshll.u32 %s1586_s3, 4  ;;  %s1245_s18 = smov [#allocation8]   ;;  %s269_s19 = int_to_ptr.hbm [resolvable:$true] %s268_s19 }
  0x1e   : > { %874 = dma.hbm_to_vmem [thread:$0]  (!%p1363_p11), %s269_s19, 256, %s271_s22, [#allocation6], %s1243_s23, %s1243_s23, %s1244_s11  }
  0x1f   : > { %s284_s8 = sshll.u32 %s1245_s18, 4  ;;  %s50_s13 = sadd.s32 1, %s1227_s26  ;;  %s285_s8 = int_to_ptr.vmem [resolvable:$true] %s284_s8 }
  0x20   : > { %s41_s16 = sadd.s32 1, %s1235_s28  ;;  %p57_p12 = scmp.ne.s32.totalorder %s1227_s26, %s1223_s25 }
  0x21   : > { %s282_s17 = sshll.u32 %s1588_s4, 4  ;;  %p43_p13 = scmp.ge.s32.totalorder %s41_s16, 2  ;;  %s283_s17 = int_to_ptr.hbm [resolvable:$true] %s282_s17 }
  0x22   : > { %877 = dma.hbm_to_vmem [thread:$0]  (!%p1363_p11), %s283_s17, 256, %s285_s8, [#allocation9], %s1243_s23, %s1243_s23, %s1244_s11  }
  0x23   : > { %p58_p0 = scmp.eq.s32.totalorder %s1239_s29, 0  ;;  %p1383_p3 = por %p173_p2, %p57_p12 }
  0x24   : > { %p895_p5 = scmp.lt.s32.totalorder %s1239_s29, 2  ;;  %s1602_s16 = smov (%p43_p13, %s41_s16), 0 }
  0x25   : > { %1590 = sst [smem:[#allocation19_spill]] %s1602_s16  ;;  %p1390_p7 = por %p58_p0, %p57_p12 }
  0x26   : > { %s298_s8 = sand.u32 1, %s1227_s26   ;;  %s45_s20 = ssub.s32 %s1235_s28, %s1602_s16 }
  0x27   : > { %p48_p10 = scmp.eq.s32.totalorder %s45_s20, 0  ;;  %s793_s22 = sshll.u32 %s298_s8, 3 }
  0x28   : > { %s794_s23 = sshll.u32 %s1235_s28, 3  ;;  %s1592_s0 = sld [smem:[#allocation20_spill]] }
  0x29   : > { %s1399_s11 = scalar_select %p48_p10, %s1227_s26, %s50_s13  }
  0x2a   : > { %s302_s18 = scalar_lea.vmem [#allocation2], %s793_s22  ;;  %p879_p2 = pnand %p895_p5, %p1390_p7 }
  0x2b   : > { %s311_s1 = sshll.u32 %s302_s18, 4  ;;  %s299_s4 = scalar_lea.sflag [#allocation3], %s298_s8  ;;  %s312_s1 = int_to_ptr.vmem [resolvable:$true] %s311_s1 }
  0x2c   : > { %320 = sbr.rel (%p1351_p8) target bundleno = 605 (0x25d), region = 40  ;;  %s1411_s13 = sand.u32 (!%p1351_p8), 1, %s1223_s25  }
  0x2d   : > { %s796_s20 = sshll.u32 (!%p1351_p8), %s1411_s13, 3  ;;  %s323_s22 = scalar_lea.sflag (!%p1351_p8), [#allocation3], %s1411_s13 }
  0x2e   : > { %s307_s17 = scalar_lea.hbm %s1592_s0, %s794_s23  ;;  %s326_s23 = scalar_lea.vmem (!%p1351_p8), [#allocation2], %s796_s20 }
  0x2f   : > { %s309_s3 = sshll.u32 %s307_s17, 4  ;;  %s310_s3 = int_to_ptr.hbm [resolvable:$true] %s309_s3 }
  0x30   : > { %881 = dma.hbm_to_vmem [thread:$0]  (!%p879_p2), %s310_s3, 128, %s312_s1, %s299_s4  }
  0x31   : > { %1198 = dma.done.wait (%p1338_p4), %s323_s22, 128  }
  0x32   : > { %1200 = vsyncadd (%p1338_p4), %s323_s22, 4294967168 }
  0x33   : > { %1202 = dma.done.wait (%p64_p1), [#allocation6], 272  }
  0x34   : > { %1204 = vsyncadd (%p64_p1), [#allocation6], 4294967024 }
  0x35   : > { %1206 = dma.done.wait (%p64_p1), [#allocation9], 256  }
  0x36   : > { %1208 = vsyncadd (%p64_p1), [#allocation9], 4294967040  ;;  %vm387_vm0 = vcmask 261120   ;;  %v384_v0 = vld [vmem:[%s326_s23] sm:$0xff]  ;;  %v1246_v2 = vmov 32.0   ;;  %v841_v16 = vld [vmem:[#allocation7] sm:$0xff] }
  0x37   : > { %v388_v1 = vsel %vm387_vm0, %v384_v0, 0.0  ;;  %965 = vrcp.f32 %v1246_v2  ;;  %v842_v14 = vld [vmem:[#allocation7 + $0x8] sm:$0xff]  ;;  %v844_v15 = vld [vmem:[#allocation8 + $0x8] sm:$0xff]  ;;  %v843_v17 = vld [vmem:[#allocation8] sm:$0xff]  ;;  %s1593_s2 = sld [smem:[#allocation22_spill]]  ;;  %s1435_s4 = sshll.u32 %s1411_s13, 4 }
  0x38   : > { %389 = vadd.xlane.f32.xlu0 %v388_v1  ;;  %451 = vmatpush.bf16.msra.mxu0 %v842_v14  ;;  %v963_v27 = vld [vmem:[#allocation5] ss:$0 sm:$0xff]  ;;  %vm488_vm5 = vcmask 60416   ;;  %s1438_s9 = scalar_lea.vmem [#allocation10], %s1435_s4  ;;  %s1247_s14 = smov 104  }
  0x39   : > { %480 = vmatpush.bf16.msra.mxu1 %v844_v15  ;;  %s1248_s21 = smov 120   ;;  %s1443_s8 = scalar_lea.vmem [#allocation11], %s1435_s4 }
  0x3a   : > { %s1249_s12 = smov 96   ;;  %s1250_s15 = smov 112  }
  0x3b   : > { %s1251_s17 = smov 88   ;;  %s1252_s18 = smov 80  }
  0x3c   : > { %452 = vmatpush.bf16.msra.mxu0 %v841_v16  ;;  %s1253_s20 = smov 72   ;;  %s1450_s22 = scalar_lea.vmem [#allocation13], %s1435_s4 }
  0x3d   : > { %v966_v3 = vpop.eup %965  ;;  %481 = vmatpush.bf16.msra.mxu1 %v843_v17  ;;  %v964_v30 = vld [vmem:[%s1593_s2] ss:$0 sm:$0xff]  ;;  %s1455_s23 = sshll.u32 %s1231_s27, 4  ;;  %s567_s4 = sshll.u32 %s1438_s9, 4  ;;  %s1466_s4 = int_to_ptr.vmem [resolvable:$true] %s567_s4 }
  0x3e   : > { %v392_v4 = vmul.f32 32.0, %v966_v3  ;;  %vm396_vm1 = vweird.f32 %v966_v3  ;;  %s584_s27 = scalar_lea.hbm %s1573_s6, %s1455_s23  ;;  %s544_s1 = scalar_lea.sflag [#allocation4], %s1411_s13 }
  0x3f   : > { %s1109_s0 = scalar_lea.hbm %s1572_s5, 32 }
  0x40   : > { %v393_v5 = vsub.f32 1.0, %v392_v4 }
  0x42   : > { %v394_v6 = vmul.f32 %v966_v3, %v393_v5 }
  0x44   : > { %v395_v7 = vadd.f32 %v966_v3, %v394_v6 }
  0x46   : > { %v397_v8 = vsel %vm396_vm1, %v966_v3, %v395_v7 }
  0xab   : > { %v390_v9 = vpop.xlane.xlu0 %389 }
  0xac   : > { %v398_v10 = vmul.f32 %v397_v8, %v390_v9 }
  0xae   : > { %v399_v11 = vsub.f32 %v384_v0, %v398_v10 }
  0xb0   : > { %v400_v12 = vmul.f32 %v399_v11, %v399_v11 }
  0xb2   : > { %v401_v13 = vsel %vm387_vm0, %v400_v12, 0.0 }
  0xb3   : > { %402 = vadd.xlane.f32.xlu0 %v401_v13 }
 0x126   : > { %v403_v18 = vpop.xlane.xlu0 %402 }
 0x127   : > { %v404_v19 = vmul.f32 %v403_v18, %v397_v8 }
 0x129   : > { %v405_v20 = vadd.f32 1e-05, %v404_v19 }
 0x12b   : > { %967 = vrsqrt.f32 %v405_v20  ;;  %vm412_vm3 = vweird.f32 %v405_v20 }
 0x131   : > { %v968_v21 = vpop.eup %967 }
 0x132   : > { %v407_v22 = vmul.f32 %v968_v21, %v405_v20  ;;  %vm413_vm2 = vweird.f32 %v968_v21 }
 0x133   : > { %vm414_vm4 = vmor %vm412_vm3, %vm413_vm2 }
 0x134   : > { %v408_v23 = vmul.f32 %v968_v21, %v407_v22 }
 0x136   : > { %v409_v24 = vmul.f32 0.5, %v408_v23 }
 0x138   : > { %v410_v25 = vsub.f32 1.5, %v409_v24 }
 0x13a   : > { %v411_v26 = vmul.f32 %v968_v21, %v410_v25 }
 0x13c   : > { %v415_v28 = vsel %vm414_vm4, %v968_v21, %v411_v26 }
 0x13d   : > { %v416_v29 = vmul.f32 %v415_v28, %v399_v11 }
 0x13f   : > { %v420_v31 = vmul.f32 %v963_v27, %v416_v29 }
 0x141   : > { %v424_v32 = vadd.f32 %v964_v30, %v420_v31 }
 0x143   : > { %v425_v33 = vpack.c.bf16 %v424_v32, %v424_v32 }
 0x145   : > { %811 = vmatmul.msk.bf16.vlgmr.msra.gmra.mxu0 %vm387_vm0, %v425_v33  ;;  %820 = vmatmul.msk.bf16.vlgmr.msra.gmra.mxu1 %vm387_vm0, %v425_v33 }
 0x1c2   : > { %v454_v34 = vpop.f32.mrf.mxu0  ;;  %v483_v35 = vpop.f32.mrf.mxu1 }
 0x1c3   : > { %v487_v36 = vpack.c.bf16 %v454_v34, %v454_v34  ;;  %v490_v37 = vpack.c.bf16 %v483_v35, %v483_v35 }
 0x1c5   : > { %489 = vst.msk [vmem:[%s1438_s9] sm:$0xf] %vm488_vm5, %v487_v36  ;;  %533 = vrot.lane.b32.xlu2 %v490_v37, %s1247_s14  ;;  %503 = vrot.lane.b32.xlu1 %v490_v37, %s1248_s21 }
 0x1c6   : > { %498 = vrot.lane.b32.xlu0 %v487_v36, %s1248_s21  ;;  %491 = vst.msk [vmem:[%s1443_s8] sm:$0xf] %vm488_vm5, %v490_v37 }
 0x1ca   : > { %v456_v38 = vpop.f32.mrf.mxu0  ;;  %v485_v39 = vpop.f32.mrf.mxu1 }
 0x1cd   : > { %493 = vrot.lane.b32.xlu2 %v490_v37, %s1249_s12  ;;  %518 = vrot.lane.b32.xlu1 %v490_v37, %s1250_s15 }
 0x1d5   : > { %508 = vrot.lane.b32.xlu1 %v490_v37, %s1251_s17  ;;  %513 = vrot.lane.b32.xlu2 %v487_v36, %s1250_s15  ;;  %s585_s17 = sshll.u32 %s1443_s8, 4  ;;  %s586_s17 = int_to_ptr.vmem [resolvable:$true] %s585_s17 }
 0x1dd   : > { %523 = vrot.lane.b32.xlu1 %v490_v37, %s1252_s18  ;;  %528 = vrot.lane.b32.xlu2 %v487_v36, %s1247_s14  ;;  %s566_s14 = scalar_lea.hbm %s1572_s5, %s1455_s23  ;;  %s548_s18 = sand.u32 1, %s1327_s30  }
 0x1de   : > { %s1464_s21 = sshll.u32 %s566_s14, 4  ;;  %s570_s21 = int_to_ptr.hbm [resolvable:$true] %s1464_s21 }
 0x1df   : > { %s1103_s3 = sshra.s32 %s570_s21, 4  ;;  %s1104_s3 = int_to_ptr.hbm [resolvable:$true] %s1103_s3 }
 0x1e0   : > { %s1105_s14 = scalar_lea.hbm %s1104_s3, 16  ;;  %p1110_p11 = scmp.lt.s32.totalorder %s1104_s3, %s1572_s5 }
 0x1e1   : > { %p1106_p1 = scmp.ne.s32.totalorder %s1104_s3, %s1105_s14  ;;  %p1111_p12 = scmp.lt.s32.totalorder %s1109_s0, %s1105_s14 }
 0x1e3   : > { %p1107_p4 = pnand %p1106_p1, %p1383_p3  ;;  %p1112_p13 = por %p1111_p12, %p1110_p11 }
 0x1e5   : > { %538 = vrot.lane.b32.xlu1 %v490_v37, %s1253_s20  ;;  %s1481_s20 = sshll.u32 %s584_s27, 4  ;;  %p1108_p8 = pneg %p1107_p4  ;;  %s588_s20 = int_to_ptr.hbm [resolvable:$true] %s1481_s20 }
 0x1e7   : > { %p1113_p0 = pnand %p1112_p13, %p1108_p8 }
 0x21f   : > { %v534_v40 = vpop.permute.xlu2 %533 }
 0x220   : > { %828 = vst.msk [vmem:[%s1443_s8 + $0xc] sm:$0xf] %vm488_vm5, %v534_v40 }
 0x227   : > { %v494_v41 = vpop.permute.xlu2 %493 }
 0x228   : > { %496 = vst.msk [vmem:[%s1450_s22] sm:$0xf] %vm488_vm5, %v494_v41 }
 0x22f   : > { %v514_v42 = vpop.permute.xlu2 %513 }
 0x230   : > { %824 = vst.msk [vmem:[%s1438_s9 + $0x8] sm:$0xf] %vm488_vm5, %v514_v42 }
 0x237   : > { %v504_v43 = vpop.permute.xlu1 %503  ;;  %v529_v44 = vpop.permute.xlu2 %528 }
 0x238   : > { %822 = vst.msk [vmem:[%s1443_s8 + $0x4] sm:$0xf] %vm488_vm5, %v504_v43  ;;  %v499_v45 = vpop.permute.xlu0 %498 }
 0x239   : > { %827 = vst.msk [vmem:[%s1438_s9 + $0xc] sm:$0xf] %vm488_vm5, %v529_v44 }
 0x23a   : > { %821 = vst.msk [vmem:[%s1438_s9 + $0x4] sm:$0xf] %vm488_vm5, %v499_v45 }
 0x23b   : > { %1116 = shalt.err (!%p1113_p0)
}
 0x23c   : > { %s1254_s30 = smov 64   ;;  %s1255_s13 = smov 4  }
 0x23d   : > { %862 = dma.vmem_to_hbm [thread:$0]  (%p1383_p3), %s1466_s4, 256, %s570_s21, %s544_s1, %s1254_s30, %s1254_s30, %s1255_s13  }
 0x23e   : > { %s1501_s0 = scalar_lea.sflag [#allocation12], %s548_s18  ;;  %s1131_s2 = sshra.s32 %s588_s20, 4  ;;  %s1132_s2 = int_to_ptr.hbm [resolvable:$true] %s1131_s2 }
 0x23f   : > { %v519_v46 = vpop.permute.xlu1 %518  ;;  %s1133_s16 = scalar_lea.hbm %s1132_s2, 16  ;;  %s1137_s3 = scalar_lea.hbm %s1573_s6, 32 }
 0x240   : > { %825 = vst.msk [vmem:[%s1443_s8 + $0x8] sm:$0xf] %vm488_vm5, %v519_v46  ;;  %p1134_p5 = scmp.ne.s32.totalorder %s1132_s2, %s1133_s16  ;;  %p1138_p2 = scmp.lt.s32.totalorder %s1132_s2, %s1573_s6 }
 0x241   : > { %p1139_p1 = scmp.lt.s32.totalorder %s1137_s3, %s1133_s16 }
 0x242   : > { %p1135_p7 = pnand %p1134_p5, %p1383_p3 }
 0x243   : > { %p1140_p4 = por %p1139_p1, %p1138_p2 }
 0x244   : > { %p1136_p10 = pneg %p1135_p7 }
 0x246   : > { %p1141_p8 = pnand %p1140_p4, %p1136_p10 }
 0x248   : > { %1144 = shalt.err (!%p1141_p8)
}
 0x249   : > { %863 = dma.vmem_to_hbm [thread:$0]  (%p1383_p3), %s586_s17, 256, %s588_s20, %s1501_s0, %s1254_s30, %s1254_s30, %s1255_s13   ;;  %v509_v47 = vpop.permute.xlu1 %508 }
 0x24a   : > { %823 = vst.msk [vmem:[%s1450_s22 + $0x4] sm:$0xf] %vm488_vm5, %v509_v47  ;;  %s602_s18 = scalar_lea.hbm %s1574_s7, %s1455_s23  ;;  %s603_s1 = sshll.u32 %s1450_s22, 4  ;;  %s604_s1 = int_to_ptr.vmem [resolvable:$true] %s603_s1 }
 0x24b   : > { %s605_s12 = sshll.u32 %s602_s18, 4  ;;  %s1165_s16 = scalar_lea.hbm %s1574_s7, 32  ;;  %s606_s12 = int_to_ptr.hbm [resolvable:$true] %s605_s12 }
 0x24c   : > { %s1159_s15 = sshra.s32 %s606_s12, 4  ;;  %s1160_s15 = int_to_ptr.hbm [resolvable:$true] %s1159_s15 }
 0x24d   : > { %s1161_s17 = scalar_lea.hbm %s1160_s15, 16  ;;  %p1166_p0 = scmp.lt.s32.totalorder %s1160_s15, %s1574_s7 }
 0x24e   : > { %p1162_p11 = scmp.ne.s32.totalorder %s1160_s15, %s1161_s17  ;;  %p1167_p5 = scmp.lt.s32.totalorder %s1165_s16, %s1161_s17 }
 0x250   : > { %p1163_p12 = pnand %p1162_p11, %p1383_p3  ;;  %p1168_p7 = por %p1167_p5, %p1166_p0 }
 0x251   : > { %v524_v48 = vpop.permute.xlu1 %523 }
 0x252   : > { %826 = vst.msk [vmem:[%s1450_s22 + $0x8] sm:$0xf] %vm488_vm5, %v524_v48  ;;  %p1164_p13 = pneg %p1163_p12 }
 0x254   : > { %p1169_p10 = pnand %p1168_p7, %p1164_p13 }
 0x259   : > { %v539_v49 = vpop.permute.xlu1 %538 }
 0x25a   : > { %829 = vst.msk [vmem:[%s1450_s22 + $0xc] sm:$0xf] %vm488_vm5, %v539_v49 }
 0x25b   : > { %1172 = shalt.err (!%p1169_p10)
}
 0x25c   : > { %864 = dma.vmem_to_hbm [thread:$0]  (%p1383_p3), %s604_s1, 256, %s606_s12, %s1501_s0, %s1254_s30, %s1254_s30, %s1255_s13  }
 0x25d PF: > { %s620_s22 = sand.u32 1, %s1219_s24   ;;  %p883_p2 = pnand %p792_p9, %p1343_p6 }
 0x25e   : > { %s621_s27 = scalar_lea.sflag [#allocation4], %s620_s22 }
 0x25f   : > { %p884_p1 = pneg %p883_p2 }
 0x261   : > { %1210 = dma.done.wait (%p884_p1), %s621_s27, 256  }
 0x262   : > { %1212 = vsyncadd (%p884_p1), %s621_s27, 4294967040  ;;  %s1594_s3 = sadd.s32 4294967294, %s1239_s29  }
 0x263   : > { %s630_s19 = sand.u32 1, %s1594_s3  }
 0x264   : > { %s631_s14 = scalar_lea.sflag [#allocation12], %s630_s19 }
 0x265   : > { %1214 = dma.done.wait (%p884_p1), %s631_s14, 512  }
 0x266   : > { %1216 = vsyncadd (%p884_p1), %s631_s14, 4294966784  ;;  %s29_s29 = sadd.s32 1, %s1239_s29   ;;  %s1595_s10 = sld [smem:[#allocation19_spill]] }
 0x267   : > { %p26_p3 = scmp.ge.s32.totalorder %s29_s29, 4   ;;  %s1596_s24 = smov %s1223_s25 }
 0x268   : > { %s1597_s25 = smov %s1227_s26  ;;  %s1598_s26 = smov %s1399_s11 }
 0x269   : > { %s1599_s27 = smov %s1235_s28  ;;  %28 = sbr.rel (!%p26_p3) target bundleno = 16 (0x10), region = 138 }
 0x26c   : > { %s1600_s28 = smov %s1595_s10 }
 0x26e   :  { %647 = vsyncpa [#allocation3], 1 }
 0x26f   :  { %649 = vsyncpa [#allocation3 + $0x1], 1 }
 0x270   :  { %650 = vsyncpa [#allocation6], 1 }
 0x271   :  { %651 = vsyncpa [#allocation9], 1 }
 0x272   :  { %652 = vsyncpa [#allocation4], 1 }
 0x273   :  { %654 = vsyncpa [#allocation4 + $0x1], 1 }
 0x274   :  { %655 = vsyncpa [#allocation12], 1 }
 0x275   :  { %657 = vsyncpa [#allocation12 + $0x1], 1 }

</bundles_post_ra>
